<compile_context>
chip_gen: v7x
topology: tpu7x:2x2x1
jax: 0.10.0
libtpu: 0.0.40
codegen_flags: <defaults>
</compile_context>

<pallas_src>
import functools

import jax
import jax.numpy as jnp
from jax.experimental import pallas as pl
from jax.experimental.pallas import tpu as pltpu


_VMEM = pl.BlockSpec(memory_space=pltpu.MemorySpace.VMEM)
_VMEM_LIMIT = 48 * 1024 * 1024  # fits every chip (v7x has 64 MiB physical VMEM)

_MBV2_SETTINGS = [
    # (expand_ratio t, out_channels c, repeats n, first_stride s)
    (1, 16, 1, 1),
    (6, 24, 2, 2),
    (6, 32, 3, 2),
    (6, 64, 4, 2),
    (6, 96, 3, 1),
    (6, 160, 3, 2),
    (6, 320, 1, 1),
]


# ---------------------------------------------------------------------------
# Stem: tiled fused matmul + bias + ReLU6 (im2col'd 3x3 conv, stride 2)
# ---------------------------------------------------------------------------

def _stem_kernel(x_ref, w_ref, b_ref, o_ref):
    y = jnp.dot(x_ref[...], w_ref[...], preferred_element_type=jnp.float32)
    y = jnp.clip(y + b_ref[...], 0.0, 6.0)
    o_ref[...] = y.astype(o_ref.dtype)


def stem_matmul(x, w, b):
    m, k = x.shape
    n_out = w.shape[1]
    tm = next((t for t in (256, 128, 64, 32, 16, 8) if m % t == 0), m)
    return pl.pallas_call(
        _stem_kernel,
        out_shape=jax.ShapeDtypeStruct((m, n_out), jnp.bfloat16),
        grid=(m // tm,),
        in_specs=[
            pl.BlockSpec((tm, k), lambda i: (i, 0)),
            pl.BlockSpec((k, n_out), lambda i: (0, 0)),
            pl.BlockSpec((1, n_out), lambda i: (0, 0)),
        ],
        out_specs=pl.BlockSpec((tm, n_out), lambda i: (i, 0)),
        compiler_params=pltpu.CompilerParams(
            dimension_semantics=("parallel",),
            vmem_limit_bytes=_VMEM_LIMIT),
    )(x, w, b)


# ---------------------------------------------------------------------------
# Fused inverted-residual block: expand + depthwise 3x3 + project (+ residual)
# ---------------------------------------------------------------------------

def _block_kernel(*refs, hw, w, cmid, chunk1, chunk2, has_expand, residual, stride):
    if has_expand:
        (x_ref, exp_w_ref, exp_b_ref, dw_w_ref, dw_b_ref,
         pj_w_ref, pj_b_ref, o_ref, mid_ref) = refs
    else:
        (x_ref, dw_w_ref, dw_b_ref,
         pj_w_ref, pj_b_ref, o_ref, mid_ref) = refs

    pad = w + 1                       # flattened halo: one full row + one pixel

    # Zero the halo rows of the flattened-spatial scratch (handles vertical padding).
    zeros = jnp.zeros((pad, cmid), jnp.float32)
    mid_ref[0:pad, :] = zeros
    mid_ref[pad + hw:pad + hw + pad, :] = zeros

    # Stage 1: pointwise expand (1x1 conv + folded BN + ReLU6) -> VMEM scratch.
    # Full spatial resolution is required here even for stride-2 depthwise taps.
    for ci in range(hw // chunk1):
        r0 = ci * chunk1
        xc = x_ref[0, r0:r0 + chunk1, :]
        if has_expand:
            e = jnp.dot(xc, exp_w_ref[...], preferred_element_type=jnp.float32)
            e = jnp.clip(e + exp_b_ref[...], 0.0, 6.0)
        else:
            e = xc.astype(jnp.float32)
        mid_ref[pad + r0:pad + r0 + chunk1, :] = e

    # Stage 2: depthwise 3x3 (+bias+ReLU6) + 1x1 projection (+residual), per row span.
    # stride==1: spans are equal row chunks covering the whole image.
    # stride==2: spans are the EVEN image rows only (the stride-2 centers along y), so the
    #            kernel performs half the dw/proj compute and half the HBM writes; the
    #            x-direction ::2 subsample is done in glue (no strided sublane access here).
    if stride == 1:
        spans = [(ci * chunk2, ci * chunk2, chunk2) for ci in range(hw // chunk2)]
    else:
        h_img = hw // w
        spans = [(2 * oy * w, oy * w, w) for oy in range(h_img // 2)]

    for in0, out0, rows in spans:
        col = (jax.lax.broadcasted_iota(jnp.int32, (rows, 1), 0) + in0) % w
        mask_l = (col > 0).astype(jnp.float32)        # left neighbour exists
        mask_r = (col < (w - 1)).astype(jnp.float32)  # right neighbour exists

        acc = jnp.zeros((rows, cmid), jnp.float32)
        t = 0
        for dy in (-1, 0, 1):
            for dx in (-1, 0, 1):
                off = dy * w + dx
                tap = mid_ref[pad + in0 + off:pad + in0 + off + rows, :]
                if dx == -1:
                    tap = tap * mask_l
                elif dx == 1:
                    tap = tap * mask_r
                acc = acc + tap * dw_w_ref[t:t + 1, :]
                t += 1
        dwv = jnp.clip(acc + dw_b_ref[...], 0.0, 6.0)

        y = jnp.dot(dwv.astype(jnp.bfloat16), pj_w_ref[...],
                    preferred_element_type=jnp.float32) + pj_b_ref[...]
        if residual:
            y = y + x_ref[0, in0:in0 + rows, :].astype(jnp.float32)
        o_ref[0, out0:out0 + rows, :] = y.astype(o_ref.dtype)


def _pick_chunk(hw, cmid, budget_bytes):
    # Keep the per-chunk f32 working arrays around <= budget to bound vreg pressure.
    target = max(8, min(512, budget_bytes // (4 * cmid)))
    c = min(hw, target)
    while hw % c:
        c -= 1
    return c


def _full2d(shape):
    return pl.BlockSpec(shape, lambda i: (0, 0))


def inverted_residual(x, blk, h, w):
    n, hw, cin = x.shape
    cmid = blk["dw_w"].shape[1]
    cout = blk["proj_w"].shape[1]
    stride = blk["stride"]
    has_expand = "exp_w" in blk
    residual = blk["use_res"]
    # Expand stage has few live arrays -> larger chunk (better MXU M); dw/proj stays tighter.
    chunk1 = _pick_chunk(hw, cmid, 128 * 1024)
    chunk2 = _pick_chunk(hw, cmid, 64 * 1024)

    out_rows = hw if stride == 1 else (h // 2) * w

    kern = functools.partial(_block_kernel, hw=hw, w=w, cmid=cmid,
                             chunk1=chunk1, chunk2=chunk2,
                             has_expand=has_expand, residual=residual, stride=stride)

    in_specs = [pl.BlockSpec((1, hw, cin), lambda i: (i, 0, 0))]
    args = [x]
    if has_expand:
        in_specs += [_full2d((cin, cmid)), _full2d((1, cmid))]
        args += [blk["exp_w"], blk["exp_b"]]
    in_specs += [_full2d((9, cmid)), _full2d((1, cmid)),
                 _full2d((cmid, cout)), _full2d((1, cout))]
    args += [blk["dw_w"], blk["dw_b"], blk["proj_w"], blk["proj_b"]]

    out = pl.pallas_call(
        kern,
        out_shape=jax.ShapeDtypeStruct((n, out_rows, cout), jnp.bfloat16),
        grid=(n,),
        in_specs=in_specs,
        out_specs=pl.BlockSpec((1, out_rows, cout), lambda i: (i, 0, 0)),
        scratch_shapes=[pltpu.VMEM((hw + 2 * (w + 1), cmid), jnp.float32)],
        compiler_params=pltpu.CompilerParams(
            dimension_semantics=("parallel",),
            vmem_limit_bytes=_VMEM_LIMIT),
    )(*args)

    if stride == 2:
        ho, wo = h // 2, w // 2
        # y was already subsampled in-kernel; take stride-2 centers along x here.
        out = out.reshape(n, ho, w, cout)[:, :, ::2, :].reshape(n, ho * wo, cout)
        return out, ho, wo
    return out, h, w


# ---------------------------------------------------------------------------
# Fused tail: 1x1 conv->1280 + ReLU6 + global avg pool + fc1/fc2/fc3 classifier
# ---------------------------------------------------------------------------

def _head_kernel(x_ref, hw_w_ref, hw_b_ref, pm_ref,
                 w1_ref, b1_ref, w2_ref, b2_ref, w3_ref, b3_ref, o_ref):
    h = jnp.dot(x_ref[...], hw_w_ref[...], preferred_element_type=jnp.float32)
    h = jnp.clip(h + hw_b_ref[...], 0.0, 6.0)                             # (M, 1280)
    pooled = jnp.dot(pm_ref[...], h, preferred_element_type=jnp.float32)  # (N, 1280)
    f1 = jnp.dot(pooled.astype(jnp.bfloat16), w1_ref[...],
                 preferred_element_type=jnp.float32) + b1_ref[...]
    f1 = jnp.maximum(f1, 0.0)
    f2 = jnp.dot(f1.astype(jnp.bfloat16), w2_ref[...],
                 preferred_element_type=jnp.float32) + b2_ref[...]
    f2 = jnp.maximum(f2, 0.0)
    o_ref[...] = jnp.dot(f2.astype(jnp.bfloat16), w3_ref[...],
                         preferred_element_type=jnp.float32) + b3_ref[...]


def head_classifier(x2d, pool_mat, p):
    n = pool_mat.shape[0]
    num_classes = p["fc3_w"].shape[1]
    return pl.pallas_call(
        _head_kernel,
        out_shape=jax.ShapeDtypeStruct((n, num_classes), jnp.float32),
        in_specs=[_VMEM] * 10,
        out_specs=_VMEM,
        compiler_params=pltpu.CompilerParams(vmem_limit_bytes=_VMEM_LIMIT),
    )(x2d, p["head_w"], p["head_b"], pool_mat,
      p["fc1_w"], p["fc1_b"], p["fc2_w"], p["fc2_b"], p["fc3_w"], p["fc3_b"])


# ---------------------------------------------------------------------------
# Glue: im2col for the stem only (3 input channels -> cheap)
# ---------------------------------------------------------------------------

def extract_patches3x3(x, stride):
    n, h, w, c = x.shape
    xp = jnp.pad(x, ((0, 0), (1, 1), (1, 1), (0, 0)))
    ho = (h + 2 - 3) // stride + 1
    wo = (w + 2 - 3) // stride + 1
    taps = []
    for ky in range(3):
        for kx in range(3):
            taps.append(xp[:, ky:ky + stride * (ho - 1) + 1:stride,
                           kx:kx + stride * (wo - 1) + 1:stride, :])
    return jnp.stack(taps, axis=0), (n, ho, wo)


# ---------------------------------------------------------------------------
# Parameters (deterministic synthetic init, BN folded, bf16 matmul weights)
# ---------------------------------------------------------------------------

def init_params(seed=42):
    keys = iter(jax.random.split(jax.random.PRNGKey(seed), 256))

    def w_init(shape, fan_in, dtype=jnp.bfloat16):
        wv = jax.random.normal(next(keys), shape, jnp.float32) * (float(fan_in) ** -0.5)
        return wv.astype(dtype)

    def b_init(c):
        return jax.random.normal(next(keys), (1, c), jnp.float32) * 0.01

    params = {}
    # stem: Conv2d(3, 32, 3, stride=2, pad=1) + folded BN, weight as im2col (27, 32)
    params["stem_w"] = w_init((27, 32), 27)
    params["stem_b"] = b_init(32)

    blocks = []
    in_c = 32
    for t, c, reps, s in _MBV2_SETTINGS:
        for i in range(reps):
            stride = s if i == 0 else 1
            mid = in_c * t
            blk = {"stride": stride, "use_res": (stride == 1 and in_c == c)}
            if t != 1:
                blk["exp_w"] = w_init((in_c, mid), in_c)          # 1x1 expand (+BN)
                blk["exp_b"] = b_init(mid)
            blk["dw_w"] = w_init((9, mid), 9, dtype=jnp.float32)  # depthwise 3x3 (+BN)
            blk["dw_b"] = b_init(mid)
            blk["proj_w"] = w_init((mid, c), mid)                 # 1x1 project (+BN)
            blk["proj_b"] = b_init(c)
            blocks.append(blk)
            in_c = c
    params["blocks"] = blocks

    # final 1x1 conv 320 -> 1280 (+folded BN), classifier head (BN1d folded, dropout=id)
    params["head_w"] = w_init((in_c, 1280), in_c)
    params["head_b"] = b_init(1280)
    params["fc1_w"] = w_init((1280, 256), 1280)
    params["fc1_b"] = b_init(256)
    params["fc2_w"] = w_init((256, 64), 256)
    params["fc2_b"] = b_init(64)
    params["fc3_w"] = w_init((64, 2), 64)
    params["fc3_b"] = b_init(2)
    return params


# ---------------------------------------------------------------------------
# Forward
# ---------------------------------------------------------------------------

def forward(params, x_nchw):
    x = jnp.transpose(x_nchw, (0, 2, 3, 1)).astype(jnp.bfloat16)  # NCHW -> NHWC, bf16
    cin = x.shape[-1]

    # Stem: 3x3 conv stride 2, BN, ReLU6 (im2col in glue, tiled fused matmul kernel)
    patches, (n, h, w) = extract_patches3x3(x, stride=2)
    pm = jnp.transpose(patches, (1, 2, 3, 0, 4)).reshape(n * h * w, 9 * cin)
    x = stem_matmul(pm, params["stem_w"], params["stem_b"]).reshape(n, h * w, -1)

    # Inverted residual blocks (one fused pallas_call each)
    for blk in params["blocks"]:
        x, h, w = inverted_residual(x, blk, h, w)

    # Fused tail: 1x1 conv -> 1280, ReLU6, adaptive_avg_pool2d((1,1)), MLP classifier
    hw = h * w
    x2d = x.reshape(n * hw, x.shape[-1])
    pool_mat = jnp.repeat(jnp.eye(n, dtype=jnp.float32), hw, axis=1) / float(hw)
    return head_classifier(x2d, pool_mat, params)


if __name__ == "__main__":
    # Small but architecture-compatible input: MobileNetV2 downsamples by 32x,
    # so a 32x32 RGB image yields a 1x1 spatial map before global pooling.
    x = jax.random.normal(jax.random.PRNGKey(0), (2, 3, 32, 32), dtype=jnp.float32)
    params = init_params(seed=42)
    logits = forward(params, x)
    jax.block_until_ready(logits)
    assert logits.shape == (2, 2) and logits.dtype == jnp.float32
    print("KERNEL_OK")
</pallas_src>

<mosaic_0001>
module attributes {stable_mosaic.version = 11 : i64} {
  func.func @_stem_kernel(%arg0: i32, %arg1: memref<256x27xbf16, #tpu.memory_space<vmem>>, %arg2: memref<27x32xbf16, #tpu.memory_space<vmem>>, %arg3: memref<1x32xf32, #tpu.memory_space<vmem>>, %arg4: memref<256x32xbf16, #tpu.memory_space<vmem>>) attributes {dimension_semantics = [#tpu.dimension_semantics<parallel>], iteration_bounds = array<i64: 2>, scalar_prefetch = 0 : i64, scratch_operands = 0 : i64, tpu.core_type = #tpu.core_type<tc>, window_params = [{transform_indices = @transform_0, window_bounds = array<i64: 256, 27>}, {pipeline_mode = #tpu.pipeline_mode<synchronous>, transform_indices = @transform_1, window_bounds = array<i64: 27, 32>}, {pipeline_mode = #tpu.pipeline_mode<synchronous>, transform_indices = @transform_2, window_bounds = array<i64: 1, 32>}, {transform_indices = @transform_3, window_bounds = array<i64: 256, 32>}]} {
    %c0 = arith.constant 0 : index
    %c0_0 = arith.constant 0 : index
    %0 = vector.load %arg1[%c0, %c0_0] : memref<256x27xbf16, #tpu.memory_space<vmem>>, vector<256x27xbf16>
    %c0_1 = arith.constant 0 : index
    %c0_2 = arith.constant 0 : index
    %1 = vector.load %arg2[%c0_1, %c0_2] : memref<27x32xbf16, #tpu.memory_space<vmem>>, vector<27x32xbf16>
    %cst = arith.constant dense<0.000000e+00> : vector<256x32xf32>
    %2 = tpu.matmul %0, %1, %cst {dimension_numbers = #tpu.dot_dimension_numbers<[1], [0], [0], [1], [0, 0, 1, 1], [], []>} : vector<256x27xbf16>, vector<27x32xbf16>, vector<256x32xf32> -> vector<256x32xf32>
    %c0_3 = arith.constant 0 : index
    %c0_4 = arith.constant 0 : index
    %3 = vector.load %arg3[%c0_3, %c0_4] : memref<1x32xf32, #tpu.memory_space<vmem>>, vector<1x32xf32>
    %4 = vector.broadcast %3 : vector<1x32xf32> to vector<256x32xf32>
    %5 = arith.addf %2, %4 : vector<256x32xf32>
    %cst_5 = arith.constant 0.000000e+00 : f32
    %cst_6 = arith.constant 6.000000e+00 : f32
    %6 = vector.broadcast %cst_5 : f32 to vector<256x32xf32>
    %7 = arith.maximumf %6, %5 : vector<256x32xf32>
    %8 = vector.broadcast %cst_6 : f32 to vector<256x32xf32>
    %9 = arith.minimumf %8, %7 : vector<256x32xf32>
    %10 = arith.truncf %9 : vector<256x32xf32> to vector<256x32xbf16>
    %c0_7 = arith.constant 0 : index
    %c0_8 = arith.constant 0 : index
    %11 = vector.load %arg4[%c0_7, %c0_8] : memref<256x32xbf16, #tpu.memory_space<vmem>>, vector<256x32xbf16>
    tpu.vector_store %arg4[%c0_7, %c0_8], %10 {strides = array<i32>} : memref<256x32xbf16, #tpu.memory_space<vmem>>, vector<256x32xbf16>,
    return
  }
  func.func @transform_0(%arg0: i32) -> (i32, i32) {
    %c0_i32 = arith.constant 0 : i32
    %c0_i32_0 = arith.constant 0 : i32
    return %arg0, %c0_i32 : i32, i32
  }
  func.func @transform_1(%arg0: i32) -> (i32, i32) {
    %c0_i32 = arith.constant 0 : i32
    %c0_i32_0 = arith.constant 0 : i32
    %c0_i32_1 = arith.constant 0 : i32
    return %c0_i32, %c0_i32_0 : i32, i32
  }
  func.func @transform_2(%arg0: i32) -> (i32, i32) {
    %c0_i32 = arith.constant 0 : i32
    %c0_i32_0 = arith.constant 0 : i32
    %c0_i32_1 = arith.constant 0 : i32
    return %c0_i32, %c0_i32_0 : i32, i32
  }
  func.func @transform_3(%arg0: i32) -> (i32, i32) {
    %c0_i32 = arith.constant 0 : i32
    %c0_i32_0 = arith.constant 0 : i32
    return %arg0, %c0_i32 : i32, i32
  }
}

</mosaic_0001>

<bundles_post_ra>
// kernel: tpu_custom_call.1
= control target key start
LH: loop header
LB: loop body
LE: loop exit
PB: predicated region body
PF: predicated region fallthrough
CT: control target
= control target key end

     0   :  { %s1031_s12 = smov 0   ;;  %s1198_s0 = inlined_call_operand.vmem [shape: bf16[512,27], index: 0, kind: input, shape index: {}]   ;;  %s1199_s1 = inlined_call_operand.vmem [shape: bf16[27,32], index: 1, kind: input, shape index: {}]   ;;  %s1200_s2 = inlined_call_operand.vmem [shape: f32[1,32], index: 2, kind: input, shape index: {}]   ;;  %s1201_s3 = inlined_call_operand.vmem [shape: bf16[512,32], index: 3, kind: output, shape index: {}]  }
   0x1 LB: > { %s807_s13 = sadd.s32 4294967295, %s1008_s12   ;;  %p811_p0 = scmp.ge.s32.totalorder %s1008_s12, 1  ;;  %s1008_s12 = sphi %s1031_s12, %s13_s12  }
   0x2   : > { %p138_p1 = scmp.lt.s32.totalorder %s1008_s12, 3 }
   0x4   : > { %p139_p2 = pnand %p811_p0, %p138_p1 }
   0x5   : > { %v984_v0 = vld [vmem:[%s1199_s1] sm:$0xff] (!%p139_p2)   ;;  %vm358_vm0 = vcmask (!%p139_p2), 1044480   ;;  %v985_v1 = vld [vmem:[%s1199_s1 + $0x8] sm:$0x3f] (!%p139_p2)   ;;  %vm359_vm1 = vcmask (!%p139_p2), 1045504   ;;  %s812_s18 = sshll.u32 (!%p139_p2), %s807_s13, 5 }
   0x6   : > { %142 = sbr.rel (%p139_p2) target bundleno = 268 (0x10c), region = 32  ;;  %935 = vmatprep.subr.bf16.mxu0 (!%p139_p2), %v984_v0  ;;  %971 = vmatprep.subr.bf16.mxu1 (!%p139_p2), %v984_v0  ;;  %v1010_v2 = vmov (!%p139_p2), 65535   ;;  %p163_p3 = scmp.lt.s32.totalorder (!%p139_p2), %s812_s18, 63  ;;  %vm309_vm2 = vcmask (!%p139_p2), 220160   ;;  %v1090_v22 = vld [vmem:[%s1200_s2] ss:$0 sm:$0xff] (!%p139_p2) }
   0x7   : > { %936 = vmatpush3.bf16.msra.mxu0 (!%p139_p2), %v984_v0  ;;  %973 = vmatpush3.bf16.msra.mxu1 (!%p139_p2), %v984_v0  ;;  %v360_v3 = vsel (!%p139_p2), %vm358_vm0, 4294967295, %v1010_v2  ;;  %vm718_vm3 = vcmask (!%p139_p2), 257024  }
   0x8   : > { %v361_v4 = vsel (!%p139_p2), %vm359_vm1, %v360_v3, 0 }
   0x9   : > { %v363_v5 = vand.u32 (!%p139_p2), %v985_v1, %v361_v4 }
   0xb   : > { %937 = vmatprep.subr.bf16.mxu0 (!%p139_p2), %v363_v5  ;;  %972 = vmatprep.subr.bf16.mxu1 (!%p139_p2), %v363_v5 }
   0xc   : > { %938 = vmatpush3.bf16.msra.mxu0 (!%p139_p2), %v363_v5  ;;  %974 = vmatpush3.bf16.msra.mxu1 (!%p139_p2), %v363_v5 }
   0xd   : > { %s1203_s18 = smov (!%p163_p3, %s812_s18), 63 }
   0xe   : > { %s813_s19 = sshll.u32 %s1203_s18, 2 }
   0xf   : > { %s1053_s22 = scalar_lea.vmem %s1198_s0, %s813_s19  ;;  %s1105_s27 = scalar_lea.vmem %s1201_s3, %s813_s19 }
  0x10   : > { %v986_v6 = vld [vmem:[%s1053_s22] sm:$0xff]   ;;  %v988_v8 = vld [vmem:[%s1053_s22 + $0x8] sm:$0xff]   ;;  %v990_v10 = vld [vmem:[%s1053_s22 + $0x10] sm:$0xff]  }
  0x11   : > { %v987_v7 = vld [vmem:[%s1053_s22 + $0x40] sm:$0xff]   ;;  %939 = vmatprep.mubr.msk.bf16.mxu0 %vm309_vm2, %v986_v6  ;;  %v989_v9 = vld [vmem:[%s1053_s22 + $0x48] sm:$0xff]   ;;  %v991_v11 = vld [vmem:[%s1053_s22 + $0x50] sm:$0xff]  }
  0x12   : > { %955 = vmatprep.mubr.msk.bf16.mxu1 %vm309_vm2, %v987_v7  ;;  %940 = vmatmul.mubr.msk.bf16.vlgmr.msra.gmra.mrb[0].mxu0 %vm309_vm2, %v988_v8  ;;  %v992_v12 = vld [vmem:[%s1053_s22 + $0x18] sm:$0xff]   ;;  %v994_v14 = vld [vmem:[%s1053_s22 + $0x20] sm:$0xff]   ;;  %v996_v16 = vld [vmem:[%s1053_s22 + $0x28] sm:$0xff]  }
  0x13   : > { %956 = vmatmul.mubr.msk.bf16.vlgmr.msra.gmra.mrb[0].mxu1 %vm309_vm2, %v989_v9  ;;  %943 = vmatprep.mubr.msk.bf16.mxu0 %vm309_vm2, %v990_v10  ;;  %v993_v13 = vld [vmem:[%s1053_s22 + $0x58] sm:$0xff]   ;;  %v995_v15 = vld [vmem:[%s1053_s22 + $0x60] sm:$0xff]   ;;  %v997_v17 = vld [vmem:[%s1053_s22 + $0x68] sm:$0xff]  }
  0x14   : > { %959 = vmatprep.mubr.msk.bf16.mxu1 %vm309_vm2, %v991_v11  ;;  %v998_v18 = vld [vmem:[%s1053_s22 + $0x30] sm:$0xff]   ;;  %v1000_v20 = vld [vmem:[%s1053_s22 + $0x38] sm:$0xff]  }
  0x15   : > { %v999_v19 = vld [vmem:[%s1053_s22 + $0x70] sm:$0xff]   ;;  %v1001_v21 = vld [vmem:[%s1053_s22 + $0x78] sm:$0xff]  }
  0x1a   : > { %944 = vmatmul.mubr.msk.bf16.gmra.mrb[4].mxu0 %vm309_vm2, %v992_v12 }
  0x1b   : > { %960 = vmatmul.mubr.msk.bf16.gmra.mrb[4].mxu1 %vm309_vm2, %v993_v13  ;;  %947 = vmatprep.mubr.msk.bf16.mxu0 %vm309_vm2, %v994_v14 }
  0x1c   : > { %963 = vmatprep.mubr.msk.bf16.mxu1 %vm309_vm2, %v995_v15 }
  0x22   : > { %948 = vmatmul.mubr.msk.bf16.gmra.mrb[8].mxu0 %vm309_vm2, %v996_v16 }
  0x23   : > { %964 = vmatmul.mubr.msk.bf16.gmra.mrb[8].mxu1 %vm309_vm2, %v997_v17  ;;  %951 = vmatprep.mubr.msk.bf16.mxu0 %vm309_vm2, %v998_v18 }
  0x24   : > { %967 = vmatprep.mubr.msk.bf16.mxu1 %vm309_vm2, %v999_v19 }
  0x2a   : > { %952 = vmatmul.mubr.msk.bf16.gmra.mrb[12].mxu0 %vm309_vm2, %v1000_v20 }
  0x2b   : > { %968 = vmatmul.mubr.msk.bf16.gmra.mrb[12].mxu1 %vm309_vm2, %v1001_v21 }
  0xe5   : > { %v941_v23 = vpop.f32.mrb[0].mxu0 }
  0xe6   : > { %v408_v24 = vadd.f32 %v941_v23, %v1090_v22  ;;  %v957_v25 = vpop.f32.mrb[0].mxu1  ;;  %v399_v26 = vpop.f32.mrb[1].mxu0 }
  0xe7   : > { %v472_v27 = vadd.f32 %v957_v25, %v1090_v22  ;;  %v400_v28 = vadd.f32 %v1090_v22, %v399_v26  ;;  %v463_v29 = vpop.f32.mrb[1].mxu1  ;;  %v942_v30 = vpop.f32.mrb[2].mxu0 }
  0xe8   : > { %v528_v31 = vmax.f32 %v408_v24, 0.0  ;;  %v464_v32 = vadd.f32 %v1090_v22, %v463_v29  ;;  %v411_v33 = vadd.f32 %v942_v30, %v1090_v22  ;;  %v958_v34 = vpop.f32.mrb[2].mxu1  ;;  %v402_v35 = vpop.f32.mrb[3].mxu0 }
  0xe9   : > { %v544_v36 = vmax.f32 %v472_v27, 0.0  ;;  %v526_v37 = vmax.f32 %v400_v28, 0.0  ;;  %v475_v38 = vadd.f32 %v958_v34, %v1090_v22  ;;  %v403_v39 = vadd.f32 %v1090_v22, %v402_v35  ;;  %v466_v40 = vpop.f32.mrb[3].mxu1 }
  0xea   : > { %v560_v41 = vmin.f32 %v528_v31, 6.0  ;;  %v542_v42 = vmax.f32 %v464_v32, 0.0  ;;  %v529_v43 = vmax.f32 %v411_v33, 0.0  ;;  %v467_v44 = vadd.f32 %v1090_v22, %v466_v40 }
  0xeb   : > { %v576_v45 = vmin.f32 %v544_v36, 6.0  ;;  %v558_v46 = vmin.f32 %v526_v37, 6.0  ;;  %v545_v47 = vmax.f32 %v475_v38, 0.0  ;;  %v527_v48 = vmax.f32 %v403_v39, 0.0 }
  0xec   : > { %v887_v49 = vpack.c.bf16 %v560_v41, %v560_v41  ;;  %v574_v50 = vmin.f32 %v542_v42, 6.0  ;;  %v561_v51 = vmin.f32 %v529_v43, 6.0  ;;  %v543_v52 = vmax.f32 %v467_v44, 0.0 }
  0xed   : > { %v903_v53 = vpack.c.bf16 %v576_v45, %v576_v45  ;;  %v885_v54 = vpack.c.bf16 %v558_v46, %v558_v46  ;;  %v577_v55 = vmin.f32 %v545_v47, 6.0  ;;  %v559_v56 = vmin.f32 %v527_v48, 6.0  ;;  %v945_v57 = vpop.f32.mrb[4].mxu0 }
  0xee   : > { %721 = vst.msk [vmem:[%s1105_s27 + $0x8] sm:$0xf] %vm718_vm3, %v887_v49  ;;  %v901_v58 = vpack.c.bf16 %v574_v50, %v574_v50  ;;  %v888_v59 = vpack.c.bf16 %v561_v51, %v561_v51  ;;  %v575_v60 = vmin.f32 %v543_v52, 6.0  ;;  %v424_v61 = vadd.f32 %v945_v57, %v1090_v22  ;;  %v961_v62 = vpop.f32.mrb[4].mxu1  ;;  %v415_v63 = vpop.f32.mrb[5].mxu0 }
  0xef   : > { %737 = vst.msk [vmem:[%s1105_s27 + $0x48] sm:$0xf] %vm718_vm3, %v903_v53  ;;  %719 = vst.msk [vmem:[%s1105_s27] sm:$0xf] %vm718_vm3, %v885_v54  ;;  %v904_v0 = vpack.c.bf16 %v577_v55, %v577_v55  ;;  %v886_v1 = vpack.c.bf16 %v559_v56, %v559_v56  ;;  %v488_v2 = vadd.f32 %v961_v62, %v1090_v22  ;;  %v479_v4 = vpop.f32.mrb[5].mxu1  ;;  %v946_v5 = vpop.f32.mrb[6].mxu0 }
  0xf0   : > { %v416_v3 = vadd.f32 %v1090_v22, %v415_v63  ;;  %735 = vst.msk [vmem:[%s1105_s27 + $0x40] sm:$0xf] %vm718_vm3, %v901_v58  ;;  %722 = vst.msk [vmem:[%s1105_s27 + $0xc] sm:$0xf] %vm718_vm3, %v888_v59  ;;  %v902_v6 = vpack.c.bf16 %v575_v60, %v575_v60  ;;  %v532_v7 = vmax.f32 %v424_v61, 0.0  ;;  %v480_v8 = vadd.f32 %v1090_v22, %v479_v4  ;;  %v962_v10 = vpop.f32.mrb[6].mxu1 }
  0xf1   : > { %v427_v9 = vadd.f32 %v946_v5, %v1090_v22  ;;  %v418_v11 = vpop.f32.mrb[7].mxu0  ;;  %738 = vst.msk [vmem:[%s1105_s27 + $0x4c] sm:$0xf] %vm718_vm3, %v904_v0  ;;  %720 = vst.msk [vmem:[%s1105_s27 + $0x4] sm:$0xf] %vm718_vm3, %v886_v1  ;;  %v548_v12 = vmax.f32 %v488_v2, 0.0  ;;  %v491_v14 = vadd.f32 %v962_v10, %v1090_v22 }
  0xf2   : > { %v530_v13 = vmax.f32 %v416_v3, 0.0  ;;  %v419_v15 = vadd.f32 %v1090_v22, %v418_v11  ;;  %v482_v16 = vpop.f32.mrb[7].mxu1  ;;  %736 = vst.msk [vmem:[%s1105_s27 + $0x44] sm:$0xf] %vm718_vm3, %v902_v6  ;;  %v564_v17 = vmin.f32 %v532_v7, 6.0  ;;  %v546_v18 = vmax.f32 %v480_v8, 0.0 }
  0xf3   : > { %v533_v19 = vmax.f32 %v427_v9, 0.0  ;;  %v483_v20 = vadd.f32 %v1090_v22, %v482_v16  ;;  %v580_v21 = vmin.f32 %v548_v12, 6.0  ;;  %v549_v24 = vmax.f32 %v491_v14, 0.0 }
  0xf4   : > { %v562_v23 = vmin.f32 %v530_v13, 6.0  ;;  %v531_v25 = vmax.f32 %v419_v15, 0.0  ;;  %v891_v26 = vpack.c.bf16 %v564_v17, %v564_v17  ;;  %v578_v27 = vmin.f32 %v546_v18, 6.0 }
  0xf5   : > { %v565_v28 = vmin.f32 %v533_v19, 6.0  ;;  %v547_v29 = vmax.f32 %v483_v20, 0.0  ;;  %v907_v30 = vpack.c.bf16 %v580_v21, %v580_v21  ;;  %v581_v32 = vmin.f32 %v549_v24, 6.0  ;;  %v949_v34 = vpop.f32.mrb[8].mxu0 }
  0xf6   : > { %v889_v31 = vpack.c.bf16 %v562_v23, %v562_v23  ;;  %v563_v33 = vmin.f32 %v531_v25, 6.0  ;;  %725 = vst.msk [vmem:[%s1105_s27 + $0x18] sm:$0xf] %vm718_vm3, %v891_v26  ;;  %v905_v35 = vpack.c.bf16 %v578_v27, %v578_v27  ;;  %v440_v38 = vadd.f32 %v949_v34, %v1090_v22  ;;  %v965_v39 = vpop.f32.mrb[8].mxu1  ;;  %v431_v40 = vpop.f32.mrb[9].mxu0 }
  0xf7   : > { %v892_v36 = vpack.c.bf16 %v565_v28, %v565_v28  ;;  %v579_v37 = vmin.f32 %v547_v29, 6.0  ;;  %741 = vst.msk [vmem:[%s1105_s27 + $0x58] sm:$0xf] %vm718_vm3, %v907_v30  ;;  %v908_v41 = vpack.c.bf16 %v581_v32, %v581_v32  ;;  %v504_v43 = vadd.f32 %v965_v39, %v1090_v22  ;;  %v495_v45 = vpop.f32.mrb[9].mxu1  ;;  %v950_v46 = vpop.f32.mrb[10].mxu0 }
  0xf8   : > { %723 = vst.msk [vmem:[%s1105_s27 + $0x10] sm:$0xf] %vm718_vm3, %v889_v31  ;;  %v890_v42 = vpack.c.bf16 %v563_v33, %v563_v33  ;;  %v432_v44 = vadd.f32 %v1090_v22, %v431_v40  ;;  %739 = vst.msk [vmem:[%s1105_s27 + $0x50] sm:$0xf] %vm718_vm3, %v905_v35  ;;  %v536_v48 = vmax.f32 %v440_v38, 0.0  ;;  %v496_v49 = vadd.f32 %v1090_v22, %v495_v45  ;;  %v966_v51 = vpop.f32.mrb[10].mxu1 }
  0xf9   : > { %726 = vst.msk [vmem:[%s1105_s27 + $0x1c] sm:$0xf] %vm718_vm3, %v892_v36  ;;  %v906_v47 = vpack.c.bf16 %v579_v37, %v579_v37  ;;  %v443_v50 = vadd.f32 %v950_v46, %v1090_v22  ;;  %v434_v52 = vpop.f32.mrb[11].mxu0  ;;  %742 = vst.msk [vmem:[%s1105_s27 + $0x5c] sm:$0xf] %vm718_vm3, %v908_v41  ;;  %v552_v53 = vmax.f32 %v504_v43, 0.0  ;;  %v507_v55 = vadd.f32 %v966_v51, %v1090_v22 }
  0xfa   : > { %724 = vst.msk [vmem:[%s1105_s27 + $0x14] sm:$0xf] %vm718_vm3, %v890_v42  ;;  %v534_v54 = vmax.f32 %v432_v44, 0.0  ;;  %v435_v56 = vadd.f32 %v1090_v22, %v434_v52  ;;  %v498_v57 = vpop.f32.mrb[11].mxu1  ;;  %v568_v58 = vmin.f32 %v536_v48, 6.0  ;;  %v550_v59 = vmax.f32 %v496_v49, 0.0 }
  0xfb   : > { %740 = vst.msk [vmem:[%s1105_s27 + $0x54] sm:$0xf] %vm718_vm3, %v906_v47  ;;  %v537_v60 = vmax.f32 %v443_v50, 0.0  ;;  %v499_v61 = vadd.f32 %v1090_v22, %v498_v57  ;;  %v584_v62 = vmin.f32 %v552_v53, 6.0  ;;  %v553_v0 = vmax.f32 %v507_v55, 0.0 }
  0xfc   : > { %v566_v63 = vmin.f32 %v534_v54, 6.0  ;;  %v535_v1 = vmax.f32 %v435_v56, 0.0  ;;  %v895_v2 = vpack.c.bf16 %v568_v58, %v568_v58  ;;  %v582_v3 = vmin.f32 %v550_v59, 6.0 }
  0xfd   : > { %v569_v4 = vmin.f32 %v537_v60, 6.0  ;;  %v551_v5 = vmax.f32 %v499_v61, 0.0  ;;  %v911_v6 = vpack.c.bf16 %v584_v62, %v584_v62  ;;  %v585_v8 = vmin.f32 %v553_v0, 6.0  ;;  %v953_v10 = vpop.f32.mrb[12].mxu0 }
  0xfe   : > { %v893_v7 = vpack.c.bf16 %v566_v63, %v566_v63  ;;  %v567_v9 = vmin.f32 %v535_v1, 6.0  ;;  %729 = vst.msk [vmem:[%s1105_s27 + $0x28] sm:$0xf] %vm718_vm3, %v895_v2  ;;  %v909_v11 = vpack.c.bf16 %v582_v3, %v582_v3  ;;  %v456_v14 = vadd.f32 %v953_v10, %v1090_v22  ;;  %v969_v15 = vpop.f32.mrb[12].mxu1  ;;  %v447_v16 = vpop.f32.mrb[13].mxu0 }
  0xff   : > { %v896_v12 = vpack.c.bf16 %v569_v4, %v569_v4  ;;  %v583_v13 = vmin.f32 %v551_v5, 6.0  ;;  %745 = vst.msk [vmem:[%s1105_s27 + $0x68] sm:$0xf] %vm718_vm3, %v911_v6  ;;  %v912_v17 = vpack.c.bf16 %v585_v8, %v585_v8  ;;  %v520_v19 = vadd.f32 %v969_v15, %v1090_v22  ;;  %v511_v21 = vpop.f32.mrb[13].mxu1  ;;  %v954_v23 = vpop.f32.mrb[14].mxu0 }
 0x100   : > { %727 = vst.msk [vmem:[%s1105_s27 + $0x20] sm:$0xf] %vm718_vm3, %v893_v7  ;;  %v894_v18 = vpack.c.bf16 %v567_v9, %v567_v9  ;;  %v448_v20 = vadd.f32 %v1090_v22, %v447_v16  ;;  %743 = vst.msk [vmem:[%s1105_s27 + $0x60] sm:$0xf] %vm718_vm3, %v909_v11  ;;  %v540_v25 = vmax.f32 %v456_v14, 0.0  ;;  %v512_v26 = vadd.f32 %v1090_v22, %v511_v21  ;;  %v970_v28 = vpop.f32.mrb[14].mxu1 }
 0x101   : > { %730 = vst.msk [vmem:[%s1105_s27 + $0x2c] sm:$0xf] %vm718_vm3, %v896_v12  ;;  %v910_v24 = vpack.c.bf16 %v583_v13, %v583_v13  ;;  %v459_v27 = vadd.f32 %v954_v23, %v1090_v22  ;;  %v450_v29 = vpop.f32.mrb[15].mxu0  ;;  %746 = vst.msk [vmem:[%s1105_s27 + $0x6c] sm:$0xf] %vm718_vm3, %v912_v17  ;;  %v556_v30 = vmax.f32 %v520_v19, 0.0  ;;  %v523_v32 = vadd.f32 %v970_v28, %v1090_v22 }
 0x102   : > { %728 = vst.msk [vmem:[%s1105_s27 + $0x24] sm:$0xf] %vm718_vm3, %v894_v18  ;;  %v538_v31 = vmax.f32 %v448_v20, 0.0  ;;  %v451_v33 = vadd.f32 %v1090_v22, %v450_v29  ;;  %v514_v34 = vpop.f32.mrb[15].mxu1  ;;  %v572_v35 = vmin.f32 %v540_v25, 6.0  ;;  %v554_v36 = vmax.f32 %v512_v26, 0.0 }
 0x103   : > { %744 = vst.msk [vmem:[%s1105_s27 + $0x64] sm:$0xf] %vm718_vm3, %v910_v24  ;;  %v541_v37 = vmax.f32 %v459_v27, 0.0  ;;  %v515_v38 = vadd.f32 %v1090_v22, %v514_v34  ;;  %v588_v39 = vmin.f32 %v556_v30, 6.0  ;;  %v557_v41 = vmax.f32 %v523_v32, 0.0 }
 0x104   : > { %v570_v40 = vmin.f32 %v538_v31, 6.0  ;;  %v539_v42 = vmax.f32 %v451_v33, 0.0  ;;  %v899_v43 = vpack.c.bf16 %v572_v35, %v572_v35  ;;  %v586_v44 = vmin.f32 %v554_v36, 6.0 }
 0x105   : > { %v573_v45 = vmin.f32 %v541_v37, 6.0  ;;  %v555_v46 = vmax.f32 %v515_v38, 0.0  ;;  %v915_v47 = vpack.c.bf16 %v588_v39, %v588_v39  ;;  %v589_v49 = vmin.f32 %v557_v41, 6.0 }
 0x106   : > { %v897_v48 = vpack.c.bf16 %v570_v40, %v570_v40  ;;  %v571_v50 = vmin.f32 %v539_v42, 6.0  ;;  %733 = vst.msk [vmem:[%s1105_s27 + $0x38] sm:$0xf] %vm718_vm3, %v899_v43  ;;  %v913_v22 = vpack.c.bf16 %v586_v44, %v586_v44 }
 0x107   : > { %v900_v51 = vpack.c.bf16 %v573_v45, %v573_v45  ;;  %v587_v52 = vmin.f32 %v555_v46, 6.0  ;;  %749 = vst.msk [vmem:[%s1105_s27 + $0x78] sm:$0xf] %vm718_vm3, %v915_v47  ;;  %v916_v53 = vpack.c.bf16 %v589_v49, %v589_v49 }
 0x108   : > { %731 = vst.msk [vmem:[%s1105_s27 + $0x30] sm:$0xf] %vm718_vm3, %v897_v48  ;;  %v898_v54 = vpack.c.bf16 %v571_v50, %v571_v50  ;;  %747 = vst.msk [vmem:[%s1105_s27 + $0x70] sm:$0xf] %vm718_vm3, %v913_v22 }
 0x109   : > { %734 = vst.msk [vmem:[%s1105_s27 + $0x3c] sm:$0xf] %vm718_vm3, %v900_v51  ;;  %v914_v55 = vpack.c.bf16 %v587_v52, %v587_v52  ;;  %750 = vst.msk [vmem:[%s1105_s27 + $0x7c] sm:$0xf] %vm718_vm3, %v916_v53 }
 0x10a   : > { %732 = vst.msk [vmem:[%s1105_s27 + $0x34] sm:$0xf] %vm718_vm3, %v898_v54 }
 0x10b   : > { %748 = vst.msk [vmem:[%s1105_s27 + $0x74] sm:$0xf] %vm718_vm3, %v914_v55 }
 0x10c PF: > { %s13_s12 = sadd.s32 1, %s1008_s12  }
 0x10d   : > { %p10_p4 = scmp.ge.s32.totalorder %s13_s12, 4  }
 0x10f   :  { %12 = sbr.rel (!%p10_p4) target bundleno = 1 (0x1), region = 62 }

</bundles_post_ra>
